<compile_context>
chip_gen: v6e
topology: v6e:2x2x1
jax: 0.10.0
libtpu: 0.0.40
codegen_flags: <defaults>
</compile_context>

<pallas_src>
import jax
import jax.numpy as jnp
from jax.experimental import pallas as pl
from jax.experimental.pallas import tpu as pltpu


def _make_triplet_kernel(h_st, h_age, h_gender):
    """Kernel factory; branch widths are baked in as static slice bounds."""
    a0 = h_st
    a1 = h_st + h_age
    a2 = h_st + h_age + h_gender

    def kernel(
        x_ref,                         # (TILE_B, F) bf16
        w0_ref, b0_ref,                # fused layer 0: (F, Hsum) bf16, (1, Hsum) f32
        st_w1, st_b1, st_w2, st_b2,    # st tail
        ag_w1, ag_b1,                  # age tail
        gd_w1, gd_b1,                  # gender tail
        out_ref,                       # (TILE_B, 8) f32: [st | age(4) | gender(2) | pad]
    ):
        x = x_ref[...]

        # ---- fused first layer: one MXU push feeds all three branches ----
        h0 = jnp.dot(x, w0_ref[...], preferred_element_type=jnp.float32) + b0_ref[...]
        h0 = jnp.maximum(h0, 0.0)

        hs = h0[:, :a0].astype(jnp.bfloat16)
        ha = h0[:, a0:a1].astype(jnp.bfloat16)
        hg = h0[:, a1:a2].astype(jnp.bfloat16)

        # ---- st branch: Linear -> ReLU -> Linear -> clamp(0, 9) ----
        h = jnp.dot(hs, st_w1[...], preferred_element_type=jnp.float32) + st_b1[...]
        h = jnp.maximum(h, 0.0).astype(jnp.bfloat16)
        st = jnp.dot(h, st_w2[...], preferred_element_type=jnp.float32) + st_b2[...]
        st = jnp.clip(st, 0.0, 9.0)

        # ---- age branch: Linear -> Softmax(-1) ----
        logits = jnp.dot(ha, ag_w1[...], preferred_element_type=jnp.float32) + ag_b1[...]
        logits = logits - jnp.max(logits, axis=-1, keepdims=True)
        e = jnp.exp(logits)
        age = e * pl.reciprocal(jnp.sum(e, axis=-1, keepdims=True), approx=True)

        # ---- gender branch: Linear -> Softmax(-1) ----
        logits = jnp.dot(hg, gd_w1[...], preferred_element_type=jnp.float32) + gd_b1[...]
        logits = logits - jnp.max(logits, axis=-1, keepdims=True)
        e = jnp.exp(logits)
        gender = e * pl.reciprocal(jnp.sum(e, axis=-1, keepdims=True), approx=True)

        # Single lane-packed output tile -> one writeback DMA per block.
        out_ref[:, 0:1] = st
        out_ref[:, 1:5] = age
        out_ref[:, 5:7] = gender
        out_ref[:, 7:8] = jnp.zeros_like(st)

    return kernel


def triplet_forward(x, params, *, tile_b=8):
    """Forward pass: batch-tiled single pallas_call; returns (x_st, x_age, x_gender)."""
    (st_w0, st_b0, st_w1, st_b1, st_w2, st_b2,
     ag_w0, ag_b0, ag_w1, ag_b1,
     gd_w0, gd_b0, gd_w1, gd_b1) = params

    H0 = st_w0.shape[1]
    H2 = ag_w0.shape[1]
    H3 = gd_w0.shape[1]

    # Fuse the three first-layer GEMMs into one (F, H0+H2+H3) weight / bias.
    w0_cat = jnp.concatenate([st_w0, ag_w0, gd_w0], axis=1).astype(jnp.bfloat16)
    b0_cat = jnp.concatenate([st_b0, ag_b0, gd_b0], axis=1).astype(jnp.float32)

    bf16 = lambda w: w.astype(jnp.bfloat16)
    f32 = lambda b: b.astype(jnp.float32)
    weights = (
        w0_cat, b0_cat,
        bf16(st_w1), f32(st_b1), bf16(st_w2), f32(st_b2),
        bf16(ag_w1), f32(ag_b1),
        bf16(gd_w1), f32(gd_b1),
    )

    B, F = x.shape
    n_tiles = -(-B // tile_b)
    Bp = n_tiles * tile_b
    if Bp != B:
        # Pad batch so the grid tiles it exactly; padded rows are sliced off below.
        x = jnp.pad(x, ((0, Bp - B), (0, 0)))
    x_bf16 = x.astype(jnp.bfloat16)

    def resident(a):
        # Full-array block with a constant index_map -> stays in VMEM across grid steps.
        return pl.BlockSpec(a.shape, lambda i: (0,) * a.ndim)

    in_specs = [pl.BlockSpec((tile_b, F), lambda i: (i, 0))]
    in_specs += [resident(w) for w in weights]

    packed = pl.pallas_call(
        _make_triplet_kernel(H0, H2, H3),
        grid=(n_tiles,),
        in_specs=in_specs,
        out_specs=pl.BlockSpec((tile_b, 8), lambda i: (i, 0)),
        out_shape=jax.ShapeDtypeStruct((Bp, 8), jnp.float32),
        compiler_params=pltpu.CompilerParams(
            dimension_semantics=("parallel",),
        ),
    )(x_bf16, *weights)

    packed = packed[:B]
    return packed[:, 0:1], packed[:, 1:5], packed[:, 5:7]


def make_params(key, input_dim, st_dims, age_dims, gender_dims):
    """Deterministic synthetic parameters. Linear weights stored as (in, out), f32."""
    def linear(k, fan_in, fan_out):
        kw, kb = jax.random.split(k)
        bound = 1.0 / jnp.sqrt(fan_in)
        w = jax.random.uniform(kw, (fan_in, fan_out), jnp.float32, -bound, bound)
        b = jax.random.uniform(kb, (1, fan_out), jnp.float32, -bound, bound)
        return w, b

    keys = jax.random.split(key, 16)
    ki = iter(keys)
    params = []

    cur = input_dim
    for d in st_dims:
        params.extend(linear(next(ki), cur, d)); cur = d
    params.extend(linear(next(ki), cur, 1))

    cur = input_dim
    for d in age_dims:
        params.extend(linear(next(ki), cur, d)); cur = d
    params.extend(linear(next(ki), cur, 4))

    cur = input_dim
    for d in gender_dims:
        params.extend(linear(next(ki), cur, d)); cur = d
    params.extend(linear(next(ki), cur, 2))

    return params


def reference_forward(x, params):
    """Pure-JAX f32 reference mirroring the PyTorch forward (eval mode)."""
    (st_w0, st_b0, st_w1, st_b1, st_w2, st_b2,
     ag_w0, ag_b0, ag_w1, ag_b1,
     gd_w0, gd_b0, gd_w1, gd_b1) = params

    h = jnp.maximum(x @ st_w0 + st_b0, 0.0)
    h = jnp.maximum(h @ st_w1 + st_b1, 0.0)
    x_st = jnp.clip(h @ st_w2 + st_b2, 0.0, 9.0)

    h = jnp.maximum(x @ ag_w0 + ag_b0, 0.0)
    x_age = jax.nn.softmax(h @ ag_w1 + ag_b1, axis=-1)

    h = jnp.maximum(x @ gd_w0 + gd_b0, 0.0)
    x_gender = jax.nn.softmax(h @ gd_w1 + gd_b1, axis=-1)
    return x_st, x_age, x_gender


if __name__ == "__main__":
    B = 16
    TILE_B = 8
    INPUT_DIM = 32
    ST_DIMS = [128, 64]
    AGE_DIMS = [128]
    GENDER_DIMS = [128]

    key = jax.random.PRNGKey(0)
    kx, kp = jax.random.split(key)
    x = jax.random.normal(kx, (B, INPUT_DIM), jnp.float32)
    params = make_params(kp, INPUT_DIM, ST_DIMS, AGE_DIMS, GENDER_DIMS)

    x_st, x_age, x_gender = jax.block_until_ready(
        triplet_forward(x, params, tile_b=TILE_B)
    )

    r_st, r_age, r_gender = reference_forward(x, params)
    assert x_st.shape == (B, 1) and x_age.shape == (B, 4) and x_gender.shape == (B, 2)
    # bf16 weights/activations + approximate EUP reciprocal -> relaxed tolerance vs f32 ref.
    assert jnp.allclose(x_st, r_st, atol=8e-2, rtol=8e-2)
    assert jnp.allclose(x_age, r_age, atol=3e-2)
    assert jnp.allclose(x_gender, r_gender, atol=3e-2)
    assert jnp.allclose(jnp.sum(x_age, axis=-1), 1.0, atol=1e-2)
    assert jnp.allclose(jnp.sum(x_gender, axis=-1), 1.0, atol=1e-2)

    print("KERNEL_OK")
</pallas_src>

<mosaic_0001>
module attributes {stable_mosaic.version = 11 : i64} {
  func.func @kernel(%arg0: i32, %arg1: memref<8x32xbf16, #tpu.memory_space<vmem>>, %arg2: memref<32x384xbf16, #tpu.memory_space<vmem>>, %arg3: memref<1x384xf32, #tpu.memory_space<vmem>>, %arg4: memref<128x64xbf16, #tpu.memory_space<vmem>>, %arg5: memref<1x64xf32, #tpu.memory_space<vmem>>, %arg6: memref<64x1xbf16, #tpu.memory_space<vmem>>, %arg7: memref<1x1xf32, #tpu.memory_space<vmem>>, %arg8: memref<128x4xbf16, #tpu.memory_space<vmem>>, %arg9: memref<1x4xf32, #tpu.memory_space<vmem>>, %arg10: memref<128x2xbf16, #tpu.memory_space<vmem>>, %arg11: memref<1x2xf32, #tpu.memory_space<vmem>>, %arg12: memref<8x8xf32, #tpu.memory_space<vmem>>) attributes {dimension_semantics = [#tpu.dimension_semantics<parallel>], iteration_bounds = array<i64: 2>, scalar_prefetch = 0 : i64, scratch_operands = 0 : i64, tpu.core_type = #tpu.core_type<tc>, window_params = [{transform_indices = @transform_0, window_bounds = array<i64: 8, 32>}, {pipeline_mode = #tpu.pipeline_mode<synchronous>, transform_indices = @transform_1, window_bounds = array<i64: 32, 384>}, {pipeline_mode = #tpu.pipeline_mode<synchronous>, transform_indices = @transform_2, window_bounds = array<i64: 1, 384>}, {pipeline_mode = #tpu.pipeline_mode<synchronous>, transform_indices = @transform_3, window_bounds = array<i64: 128, 64>}, {pipeline_mode = #tpu.pipeline_mode<synchronous>, transform_indices = @transform_4, window_bounds = array<i64: 1, 64>}, {pipeline_mode = #tpu.pipeline_mode<synchronous>, transform_indices = @transform_5, window_bounds = array<i64: 64, 1>}, {pipeline_mode = #tpu.pipeline_mode<synchronous>, transform_indices = @transform_6, window_bounds = array<i64: 1, 1>}, {pipeline_mode = #tpu.pipeline_mode<synchronous>, transform_indices = @transform_7, window_bounds = array<i64: 128, 4>}, {pipeline_mode = #tpu.pipeline_mode<synchronous>, transform_indices = @transform_8, window_bounds = array<i64: 1, 4>}, {pipeline_mode = #tpu.pipeline_mode<synchronous>, transform_indices = @transform_9, window_bounds = array<i64: 128, 2>}, {pipeline_mode = #tpu.pipeline_mode<synchronous>, transform_indices = @transform_10, window_bounds = array<i64: 1, 2>}, {transform_indices = @transform_11, window_bounds = array<i64: 8, 8>}]} {
    %c0 = arith.constant 0 : index
    %c0_0 = arith.constant 0 : index
    %0 = vector.load %arg1[%c0, %c0_0] : memref<8x32xbf16, #tpu.memory_space<vmem>>, vector<8x32xbf16>
    %c0_1 = arith.constant 0 : index
    %c0_2 = arith.constant 0 : index
    %1 = vector.load %arg2[%c0_1, %c0_2] : memref<32x384xbf16, #tpu.memory_space<vmem>>, vector<32x384xbf16>
    %cst = arith.constant dense<0.000000e+00> : vector<8x384xf32>
    %2 = tpu.matmul %0, %1, %cst {dimension_numbers = #tpu.dot_dimension_numbers<[1], [0], [0], [1], [0, 0, 1, 1], [], []>} : vector<8x32xbf16>, vector<32x384xbf16>, vector<8x384xf32> -> vector<8x384xf32>
    %c0_3 = arith.constant 0 : index
    %c0_4 = arith.constant 0 : index
    %3 = vector.load %arg3[%c0_3, %c0_4] : memref<1x384xf32, #tpu.memory_space<vmem>>, vector<1x384xf32>
    %4 = vector.broadcast %3 : vector<1x384xf32> to vector<8x384xf32>
    %5 = arith.addf %2, %4 : vector<8x384xf32>
    %cst_5 = arith.constant 0.000000e+00 : f32
    %6 = vector.broadcast %cst_5 : f32 to vector<8x384xf32>
    %7 = arith.maximumf %5, %6 : vector<8x384xf32>
    %8 = vector.extract_strided_slice %7 {offsets = [0, 0], sizes = [8, 128], strides = [1, 1]} : vector<8x384xf32> to vector<8x128xf32>
    %9 = arith.truncf %8 : vector<8x128xf32> to vector<8x128xbf16>
    %10 = vector.extract_strided_slice %7 {offsets = [0, 128], sizes = [8, 128], strides = [1, 1]} : vector<8x384xf32> to vector<8x128xf32>
    %11 = arith.truncf %10 : vector<8x128xf32> to vector<8x128xbf16>
    %12 = vector.extract_strided_slice %7 {offsets = [0, 256], sizes = [8, 128], strides = [1, 1]} : vector<8x384xf32> to vector<8x128xf32>
    %13 = arith.truncf %12 : vector<8x128xf32> to vector<8x128xbf16>
    %c0_6 = arith.constant 0 : index
    %c0_7 = arith.constant 0 : index
    %14 = vector.load %arg4[%c0_6, %c0_7] : memref<128x64xbf16, #tpu.memory_space<vmem>>, vector<128x64xbf16>
    %cst_8 = arith.constant dense<0.000000e+00> : vector<8x64xf32>
    %15 = tpu.matmul %9, %14, %cst_8 {dimension_numbers = #tpu.dot_dimension_numbers<[1], [0], [0], [1], [0, 0, 1, 1], [], []>} : vector<8x128xbf16>, vector<128x64xbf16>, vector<8x64xf32> -> vector<8x64xf32>
    %c0_9 = arith.constant 0 : index
    %c0_10 = arith.constant 0 : index
    %16 = vector.load %arg5[%c0_9, %c0_10] : memref<1x64xf32, #tpu.memory_space<vmem>>, vector<1x64xf32>
    %17 = vector.broadcast %16 : vector<1x64xf32> to vector<8x64xf32>
    %18 = arith.addf %15, %17 : vector<8x64xf32>
    %cst_11 = arith.constant 0.000000e+00 : f32
    %19 = vector.broadcast %cst_11 : f32 to vector<8x64xf32>
    %20 = arith.maximumf %18, %19 : vector<8x64xf32>
    %21 = arith.truncf %20 : vector<8x64xf32> to vector<8x64xbf16>
    %c0_12 = arith.constant 0 : index
    %c0_13 = arith.constant 0 : index
    %22 = vector.load %arg6[%c0_12, %c0_13] : memref<64x1xbf16, #tpu.memory_space<vmem>>, vector<64x1xbf16>
    %cst_14 = arith.constant dense<0.000000e+00> : vector<8x1xf32>
    %23 = tpu.matmul %21, %22, %cst_14 {dimension_numbers = #tpu.dot_dimension_numbers<[1], [0], [0], [1], [0, 0, 1, 1], [], []>} : vector<8x64xbf16>, vector<64x1xbf16>, vector<8x1xf32> -> vector<8x1xf32>
    %c0_15 = arith.constant 0 : index
    %c0_16 = arith.constant 0 : index
    %24 = vector.load %arg7[%c0_15, %c0_16] : memref<1x1xf32, #tpu.memory_space<vmem>>, vector<1x1xf32>
    %25 = vector.broadcast %24 : vector<1x1xf32> to vector<8x1xf32>
    %26 = arith.addf %23, %25 : vector<8x1xf32>
    %cst_17 = arith.constant 0.000000e+00 : f32
    %cst_18 = arith.constant 9.000000e+00 : f32
    %27 = vector.broadcast %cst_17 : f32 to vector<8x1xf32>
    %28 = arith.maximumf %27, %26 : vector<8x1xf32>
    %29 = vector.broadcast %cst_18 : f32 to vector<8x1xf32>
    %30 = arith.minimumf %29, %28 : vector<8x1xf32>
    %c0_19 = arith.constant 0 : index
    %c0_20 = arith.constant 0 : index
    %31 = vector.load %arg8[%c0_19, %c0_20] : memref<128x4xbf16, #tpu.memory_space<vmem>>, vector<128x4xbf16>
    %cst_21 = arith.constant dense<0.000000e+00> : vector<8x4xf32>
    %32 = tpu.matmul %11, %31, %cst_21 {dimension_numbers = #tpu.dot_dimension_numbers<[1], [0], [0], [1], [0, 0, 1, 1], [], []>} : vector<8x128xbf16>, vector<128x4xbf16>, vector<8x4xf32> -> vector<8x4xf32>
    %c0_22 = arith.constant 0 : index
    %c0_23 = arith.constant 0 : index
    %33 = vector.load %arg9[%c0_22, %c0_23] : memref<1x4xf32, #tpu.memory_space<vmem>>, vector<1x4xf32>
    %34 = vector.broadcast %33 : vector<1x4xf32> to vector<8x4xf32>
    %35 = arith.addf %32, %34 : vector<8x4xf32>
    %cst_24 = arith.constant dense<0xFF800000> : vector<8xf32>
    %36 = vector.multi_reduction <maximumf>, %35, %cst_24 [1] : vector<8x4xf32> to vector<8xf32>
    %37 = vector.shape_cast %36 : vector<8xf32> to vector<8x1xf32>
    %38 = vector.broadcast %37 : vector<8x1xf32> to vector<8x4xf32>
    %39 = arith.subf %35, %38 : vector<8x4xf32>
    %40 = math.exp %39 : vector<8x4xf32>
    %cst_25 = arith.constant dense<0.000000e+00> : vector<8xf32>
    %41 = vector.multi_reduction <add>, %40, %cst_25 [1] : vector<8x4xf32> to vector<8xf32>
    %42 = vector.shape_cast %41 : vector<8xf32> to vector<8x1xf32>
    %43 = tpu.reciprocal %42 {approx = true} : vector<8x1xf32> -> vector<8x1xf32>
    %44 = vector.broadcast %43 : vector<8x1xf32> to vector<8x4xf32>
    %45 = arith.mulf %40, %44 : vector<8x4xf32>
    %c0_26 = arith.constant 0 : index
    %c0_27 = arith.constant 0 : index
    %46 = vector.load %arg10[%c0_26, %c0_27] : memref<128x2xbf16, #tpu.memory_space<vmem>>, vector<128x2xbf16>
    %cst_28 = arith.constant dense<0.000000e+00> : vector<8x2xf32>
    %47 = tpu.matmul %13, %46, %cst_28 {dimension_numbers = #tpu.dot_dimension_numbers<[1], [0], [0], [1], [0, 0, 1, 1], [], []>} : vector<8x128xbf16>, vector<128x2xbf16>, vector<8x2xf32> -> vector<8x2xf32>
    %c0_29 = arith.constant 0 : index
    %c0_30 = arith.constant 0 : index
    %48 = vector.load %arg11[%c0_29, %c0_30] : memref<1x2xf32, #tpu.memory_space<vmem>>, vector<1x2xf32>
    %49 = vector.broadcast %48 : vector<1x2xf32> to vector<8x2xf32>
    %50 = arith.addf %47, %49 : vector<8x2xf32>
    %cst_31 = arith.constant dense<0xFF800000> : vector<8xf32>
    %51 = vector.multi_reduction <maximumf>, %50, %cst_31 [1] : vector<8x2xf32> to vector<8xf32>
    %52 = vector.shape_cast %51 : vector<8xf32> to vector<8x1xf32>
    %53 = vector.broadcast %52 : vector<8x1xf32> to vector<8x2xf32>
    %54 = arith.subf %50, %53 : vector<8x2xf32>
    %55 = math.exp %54 : vector<8x2xf32>
    %cst_32 = arith.constant dense<0.000000e+00> : vector<8xf32>
    %56 = vector.multi_reduction <add>, %55, %cst_32 [1] : vector<8x2xf32> to vector<8xf32>
    %57 = vector.shape_cast %56 : vector<8xf32> to vector<8x1xf32>
    %58 = tpu.reciprocal %57 {approx = true} : vector<8x1xf32> -> vector<8x1xf32>
    %59 = vector.broadcast %58 : vector<8x1xf32> to vector<8x2xf32>
    %60 = arith.mulf %55, %59 : vector<8x2xf32>
    %c0_33 = arith.constant 0 : index
    %c0_34 = arith.constant 0 : index
    %61 = vector.load %arg12[%c0_33, %c0_34] : memref<8x8xf32, #tpu.memory_space<vmem>>, vector<8x1xf32>
    tpu.vector_store %arg12[%c0_33, %c0_34], %30 {strides = array<i32>} : memref<8x8xf32, #tpu.memory_space<vmem>>, vector<8x1xf32>,
    %c0_35 = arith.constant 0 : index
    %c1 = arith.constant 1 : index
    %62 = vector.load %arg12[%c0_35, %c1] : memref<8x8xf32, #tpu.memory_space<vmem>>, vector<8x4xf32>
    tpu.vector_store %arg12[%c0_35, %c1], %45 {strides = array<i32>} : memref<8x8xf32, #tpu.memory_space<vmem>>, vector<8x4xf32>,
    %c0_36 = arith.constant 0 : index
    %c5 = arith.constant 5 : index
    %63 = vector.load %arg12[%c0_36, %c5] : memref<8x8xf32, #tpu.memory_space<vmem>>, vector<8x2xf32>
    tpu.vector_store %arg12[%c0_36, %c5], %60 {strides = array<i32>} : memref<8x8xf32, #tpu.memory_space<vmem>>, vector<8x2xf32>,
    %cst_37 = arith.constant 0.000000e+00 : f32
    %64 = vector.broadcast %cst_37 : f32 to vector<8x1xf32>
    %c0_38 = arith.constant 0 : index
    %c7 = arith.constant 7 : index
    %65 = vector.load %arg12[%c0_38, %c7] : memref<8x8xf32, #tpu.memory_space<vmem>>, vector<8x1xf32>
    tpu.vector_store %arg12[%c0_38, %c7], %64 {strides = array<i32>} : memref<8x8xf32, #tpu.memory_space<vmem>>, vector<8x1xf32>,
    return
  }
  func.func @transform_0(%arg0: i32) -> (i32, i32) {
    %c0_i32 = arith.constant 0 : i32
    %c0_i32_0 = arith.constant 0 : i32
    return %arg0, %c0_i32 : i32, i32
  }
  func.func @transform_1(%arg0: i32) -> (i32, i32) {
    %c0_i32 = arith.constant 0 : i32
    %c0_i32_0 = arith.constant 0 : i32
    %c0_i32_1 = arith.constant 0 : i32
    return %c0_i32, %c0_i32_0 : i32, i32
  }
  func.func @transform_2(%arg0: i32) -> (i32, i32) {
    %c0_i32 = arith.constant 0 : i32
    %c0_i32_0 = arith.constant 0 : i32
    %c0_i32_1 = arith.constant 0 : i32
    return %c0_i32, %c0_i32_0 : i32, i32
  }
  func.func @transform_3(%arg0: i32) -> (i32, i32) {
    %c0_i32 = arith.constant 0 : i32
    %c0_i32_0 = arith.constant 0 : i32
    %c0_i32_1 = arith.constant 0 : i32
    return %c0_i32, %c0_i32_0 : i32, i32
  }
  func.func @transform_4(%arg0: i32) -> (i32, i32) {
    %c0_i32 = arith.constant 0 : i32
    %c0_i32_0 = arith.constant 0 : i32
    %c0_i32_1 = arith.constant 0 : i32
    return %c0_i32, %c0_i32_0 : i32, i32
  }
  func.func @transform_5(%arg0: i32) -> (i32, i32) {
    %c0_i32 = arith.constant 0 : i32
    %c0_i32_0 = arith.constant 0 : i32
    %c0_i32_1 = arith.constant 0 : i32
    return %c0_i32, %c0_i32_0 : i32, i32
  }
  func.func @transform_6(%arg0: i32) -> (i32, i32) {
    %c0_i32 = arith.constant 0 : i32
    %c0_i32_0 = arith.constant 0 : i32
    %c0_i32_1 = arith.constant 0 : i32
    return %c0_i32, %c0_i32_0 : i32, i32
  }
  func.func @transform_7(%arg0: i32) -> (i32, i32) {
    %c0_i32 = arith.constant 0 : i32
    %c0_i32_0 = arith.constant 0 : i32
    %c0_i32_1 = arith.constant 0 : i32
    return %c0_i32, %c0_i32_0 : i32, i32
  }
  func.func @transform_8(%arg0: i32) -> (i32, i32) {
    %c0_i32 = arith.constant 0 : i32
    %c0_i32_0 = arith.constant 0 : i32
    %c0_i32_1 = arith.constant 0 : i32
    return %c0_i32, %c0_i32_0 : i32, i32
  }
  func.func @transform_9(%arg0: i32) -> (i32, i32) {
    %c0_i32 = arith.constant 0 : i32
    %c0_i32_0 = arith.constant 0 : i32
    %c0_i32_1 = arith.constant 0 : i32
    return %c0_i32, %c0_i32_0 : i32, i32
  }
  func.func @transform_10(%arg0: i32) -> (i32, i32) {
    %c0_i32 = arith.constant 0 : i32
    %c0_i32_0 = arith.constant 0 : i32
    %c0_i32_1 = arith.constant 0 : i32
    return %c0_i32, %c0_i32_0 : i32, i32
  }
  func.func @transform_11(%arg0: i32) -> (i32, i32) {
    %c0_i32 = arith.constant 0 : i32
    %c0_i32_0 = arith.constant 0 : i32
    return %arg0, %c0_i32 : i32, i32
  }
}

</mosaic_0001>

<bundles_post_ra>
// kernel: tpu_custom_call.1
= control target key start
LH: loop header
LB: loop body
LE: loop exit
PB: predicated region body
PF: predicated region fallthrough
CT: control target
= control target key end

     0   :  { %s1345_s19 = smov 0   ;;  %s1546_s0 = inlined_call_operand.vmem [shape: bf16[16,32], index: 0, kind: input, shape index: {}]   ;;  %s1547_s1 = inlined_call_operand.vmem [shape: bf16[32,384], index: 1, kind: input, shape index: {}]   ;;  %s1548_s2 = inlined_call_operand.vmem [shape: f32[1,384], index: 2, kind: input, shape index: {}]   ;;  %s1549_s3 = inlined_call_operand.vmem [shape: bf16[128,64], index: 3, kind: input, shape index: {}]   ;;  %s1550_s4 = inlined_call_operand.vmem [shape: f32[1,64], index: 4, kind: input, shape index: {}]   ;;  %s1551_s5 = inlined_call_operand.vmem [shape: bf16[64,1], index: 5, kind: input, shape index: {}]   ;;  %s1552_s6 = inlined_call_operand.<no memory space> [shape: f32[1,1], index: 6, kind: input, shape index: {}]   ;;  %s1553_s7 = inlined_call_operand.vmem [shape: bf16[128,4], index: 7, kind: input, shape index: {}]   ;;  %s1554_s8 = inlined_call_operand.vmem [shape: f32[1,4], index: 8, kind: input, shape index: {}]   ;;  %s1555_s9 = inlined_call_operand.vmem [shape: bf16[128,2], index: 9, kind: input, shape index: {}]   ;;  %s1556_s10 = inlined_call_operand.vmem [shape: f32[1,2], index: 10, kind: input, shape index: {}]   ;;  %s1557_s11 = inlined_call_operand.vmem [shape: f32[16,8], index: 11, kind: output, shape index: {}]  }
   0x1   :  { %v16_v0 = vstv %s1552_s6 }
   0x2   :  { %17 = vst [vmem:[#allocation2] sm:$0x1] %v16_v0 }
   0x3 LB: > { %s1047_s20 = sadd.s32 4294967295, %s1275_s19   ;;  %p1051_p0 = scmp.ge.s32.totalorder %s1275_s19, 1  ;;  %s1275_s19 = sphi %s1345_s19, %s23_s19  }
   0x4   : > { %p338_p1 = scmp.lt.s32.totalorder %s1275_s19, 3 }
   0x6   : > { %p339_p2 = pnand %p1051_p0, %p338_p1 }
   0x7   : > { %p376_p3 = scmp.lt.s32.totalorder (!%p339_p2), %s1047_s20, 1  ;;  %s1280_s12 = smov (!%p339_p2), 1  }
   0x8   : > { %342 = sbr.rel (%p339_p2) target bundleno = 1080 (0x438), region = 64  ;;  %s1281_s13 = smov (!%p339_p2), 5  }
   0xd   : > { %v1225_v1 = vld [vmem:[%s1547_s1 + $0x1c] ss:$12 sps:$4 sm:$0xff]   ;;  %v1227_v2 = vld [vmem:[%s1547_s1 + $0x18] ss:$12 sps:$4 sm:$0xff]   ;;  %v1277_v3 = vmov 0   ;;  %s1559_s20 = smov (!%p376_p3, %s1047_s20), 1  ;;  %v396_v21 = vlaneseq }
   0xe   : > { %479 = vmatprep.mubr.bf16.mxu1 %v1277_v3  ;;  %459 = vmatprep.subr.bf16.mxu1 %v1225_v1  ;;  %v1228_v4 = vld [vmem:[%s1547_s1 + $0x4] ss:$12 sps:$4 sm:$0xff]   ;;  %v1230_v5 = vld [vmem:[%s1547_s1] ss:$12 sps:$4 sm:$0xff]   ;;  %v1278_v6 = vmov 0.0   ;;  %v1231_v7 = vld [vmem:[%s1549_s3 + $0x38] sm:$0xff]  }
   0xf   : > { %1140 = vmatprep.subr.bf16.mxu0 %v1278_v6  ;;  %460 = vmatpush1.bf16.msra.mxu1 %v1227_v2  ;;  %s1052_s30 = sshll.u32 %s1559_s20, 2  ;;  %v1232_v8 = vld [vmem:[%s1549_s3 + $0x30] sm:$0xff]   ;;  %vm443_vm0 = vcmask 261120   ;;  %v1233_v10 = vld [vmem:[%s1549_s3 + $0x28] sm:$0xff]   ;;  %v1234_v11 = vld [vmem:[%s1549_s3 + $0x20] sm:$0xff]   ;;  %vm1279_vm1 = vmmov 0  }
  0x10   : > { %461 = vmatprep.subr.bf16.mxu1 %v1228_v4  ;;  %1141 = vmatpush3.bf16.msra.mxu0 %v1231_v7  ;;  %s379_s16 = scalar_lea.vmem %s1546_s0, %s1052_s30  ;;  %v1235_v12 = vld [vmem:[%s1549_s3 + $0x18] sm:$0xff]   ;;  %v1236_v13 = vld [vmem:[%s1549_s3 + $0x10] sm:$0xff]   ;;  %v1237_v14 = vld [vmem:[%s1549_s3 + $0x8] sm:$0xff]   ;;  %v1433_v22 = vshrl.u32 %v396_v21, 7  ;;  %vm686_vm2 = vcmask 523264   ;;  %s1053_s24 = sshll.u32 %s1559_s20, 3 }
  0x11   : > { %1142 = vmatprep.subr.bf16.mxu0 %v1278_v6  ;;  %v385_v9 = vld [vmem:[%s379_s16] sm:$0xf]  ;;  %1156 = vmatprep.mubr.msk.bf16.mxu0 %vm1279_vm1, %v1278_v6  ;;  %v1240_v17 = vld [vmem:[%s1547_s1 + $0x8] ss:$12 sps:$4 sm:$0xff]   ;;  %v1241_v18 = vld [vmem:[%s1551_s5 + $0x18] sm:$0xff]   ;;  %s1526_s27 = scalar_lea.vmem %s1557_s11, %s1053_s24  ;;  %vm978_vm3 = vcmask 7168  }
  0x12   : > { %v1238_v15 = vld [vmem:[%s1549_s3] sm:$0xff]   ;;  %v1242_v19 = vld [vmem:[%s1551_s5 + $0x10] sm:$0xff]   ;;  %v1243_v20 = vld [vmem:[%s1551_s5 + $0x8] sm:$0xff]   ;;  %v398_v23 = vsub.s32 0, %v1433_v22  ;;  %v406_v40 = vsub.s32 2, %v1433_v22  ;;  %v402_v0 = vsub.s32 1, %v1433_v22 }
  0x13   : > { %462 = vmatpush1.bf16.msra.mxu1 %v1230_v5  ;;  %v1239_v16 = vld [vmem:[%s1547_s1 + $0x20] ss:$12 sps:$4 sm:$0xff]   ;;  %v1245_v34 = vld [vmem:[%s1555_s9 + $0x38] sm:$0xff]   ;;  %v1247_v35 = vld [vmem:[%s1555_s9 + $0x30] sm:$0xff]   ;;  %vm843_vm4 = vcmask 31744   ;;  %vm966_vm5 = vcmask 15360  }
  0x14   : > { %1143 = vmatpush3.bf16.msra.mxu0 %v1232_v8  ;;  %1132 = vmatprep.subr.bf16.mxu1 %v1278_v6  ;;  %v1439_v24 = vld [vmem:[%s1548_s2] sm:$0x7]  ;;  %v1249_v36 = vld [vmem:[%s1555_s9 + $0x28] sm:$0xff]   ;;  %v1253_v38 = vld [vmem:[%s1555_s9 + $0x18] sm:$0xff]   ;;  %vm984_vm6 = vcmask 39944   ;;  %vm990_vm7 = vcmask 56360  }
  0x15   : > { %1144 = vmatprep.subr.bf16.mxu0 %v1278_v6  ;;  %v399_v25 = vrot.slane %v1439_v24, %v398_v23  ;;  %v1244_v33 = vld [vmem:[%s1551_s5] sm:$0xff]   ;;  %v1255_v39 = vld [vmem:[%s1555_s9 + $0x10] sm:$0xff]   ;;  %v1257_v42 = vld [vmem:[%s1555_s9 + $0x8] sm:$0xff]   ;;  %v407_v43 = vrot.slane %v1439_v24, %v406_v40  ;;  %v403_v2 = vrot.slane %v1439_v24, %v402_v0  ;;  %vm992_vm8 = vcmask 64568  }
  0x16   : > { %1060 = vmatmul.mubr.msk.bf16.vlgmr.msra.gmra.mxu1 %vm443_vm0, %v385_v9  ;;  %v1251_v37 = vld [vmem:[%s1555_s9 + $0x20] sm:$0xff]   ;;  %v1246_v57 = vld [vmem:[%s1553_s7 + $0x38] sm:$0xff]   ;;  %v1248_v60 = vld [vmem:[%s1553_s7 + $0x30] sm:$0xff]  }
  0x17   : > { %1136 = vmatprep.mubr.msk.bf16.mxu1 %vm1279_vm1, %v1278_v6  ;;  %1133 = vmatpush3.bf16.msra.mxu1 %v1239_v16  ;;  %v1259_v47 = vld [vmem:[%s1555_s9] sm:$0xff]   ;;  %v1250_v61 = vld [vmem:[%s1553_s7 + $0x28] sm:$0xff]   ;;  %v1254_v63 = vld [vmem:[%s1553_s7 + $0x18] sm:$0xff]  }
  0x18   : > { %1145 = vmatpush3.bf16.msra.mxu0 %v1233_v10  ;;  %1134 = vmatprep.subr.bf16.mxu1 %v1278_v6  ;;  %v1062_v51 = vld [vmem:[%s1550_s4] ss:$0 sm:$0xff]  ;;  %v1256_v1 = vld [vmem:[%s1553_s7 + $0x10] sm:$0xff]   ;;  %v1258_v3 = vld [vmem:[%s1553_s7 + $0x8] sm:$0xff]  }
  0x19   : > { %1146 = vmatprep.subr.bf16.mxu0 %v1278_v6  ;;  %v1252_v62 = vld [vmem:[%s1553_s7 + $0x20] sm:$0xff]  }
  0x1a   : > { %v1260_v5 = vld [vmem:[%s1553_s7] sm:$0xff]  }
  0x1b   : > { %1135 = vmatpush3.bf16.msra.mxu1 %v1240_v17  ;;  %v1086_v21 = vld [vmem:[%s1556_s10] ss:$0 sm:$0xff] }
  0x1c   : > { %1147 = vmatpush3.bf16.msra.mxu0 %v1234_v11  ;;  %1160 = vmatprep.subr.bf16.mxu1 %v1278_v6  ;;  %v1077_v22 = vld [vmem:[%s1554_s8] ss:$0 sm:$0xff] }
  0x1d   : > { %1148 = vmatprep.subr.bf16.mxu0 %v1278_v6 }
  0x1e   : > { %1137 = vmatmul.mubr.msk.bf16.vlgmr.msra.gmra.mxu1 %vm443_vm0, %v385_v9 }
  0x1f   : > { %1161 = vmatpush3.bf16.msra.mxu1 %v1241_v18  ;;  %1168 = vmatprep.mubr.msk.bf16.mxu1 %vm1279_vm1, %v1278_v6 }
  0x20   : > { %1149 = vmatpush3.bf16.msra.mxu0 %v1235_v12  ;;  %1162 = vmatprep.subr.bf16.mxu1 %v1278_v6 }
  0x21   : > { %1150 = vmatprep.subr.bf16.mxu0 %v1278_v6 }
  0x23   : > { %1163 = vmatpush3.bf16.msra.mxu1 %v1242_v19 }
  0x24   : > { %1151 = vmatpush3.bf16.msra.mxu0 %v1236_v13  ;;  %1164 = vmatprep.subr.bf16.mxu1 %v1278_v6  ;;  %v1071_v13 = vld [vmem:[#allocation2] ss:$0 sm:$0xff] }
  0x25   : > { %1152 = vmatprep.subr.bf16.mxu0 %v1278_v6 }
  0x27   : > { %1165 = vmatpush3.bf16.msra.mxu1 %v1243_v20 }
  0x28   : > { %1153 = vmatpush3.bf16.msra.mxu0 %v1237_v14  ;;  %1166 = vmatprep.subr.bf16.mxu1 %v1278_v6 }
  0x29   : > { %1154 = vmatprep.subr.bf16.mxu0 %v1278_v6 }
  0x2b   : > { %1167 = vmatpush3.bf16.msra.mxu1 %v1244_v33 }
  0x2c   : > { %1155 = vmatpush3.bf16.msra.mxu0 %v1238_v15  ;;  %1172 = vmatprep.subr.bf16.mxu1 %v1278_v6 }
  0x2d   : > { %1192 = vmatprep.subr.bf16.mxu0 %v1278_v6 }
  0xd6   : > { %v481_v26 = vpop.f32.mrf.mxu1 }
  0xd7   : > { %v482_v27 = vadd.f32 %v481_v26, %v399_v25 }
  0xd8   : > { %v1442_v28 = vpop.f32.mrf.mxu1 }
  0xd9   : > { %v528_v29 = vmax.f32 %v482_v27, 0.0  ;;  %v484_v4 = vadd.f32 %v1442_v28, %v403_v2 }
  0xda   : > { %v485_v30 = vpop.f32.mrf.mxu1 }
  0xdb   : > { %v531_v31 = vpack.c.bf16 %v528_v29, %v528_v29  ;;  %v529_v7 = vmax.f32 %v484_v4, 0.0 }
  0xdc   : > { %v486_v32 = vpop.f32.mrf.mxu1 }
  0xdd   : > { %1157 = vmatmul.mubr.bf16.vlgmr.msra.gmra.mxu0 %v531_v31  ;;  %v532_v8 = vpack.c.bf16 %v529_v7, %v529_v7 }
  0xde   : > { %1208 = vmatprep.mubr.msk.bf16.mxu0 %vm1279_vm1, %v1278_v6  ;;  %1193 = vmatpush3.bf16.msra.mxu0 %v1245_v34  ;;  %v522_v41 = vpop.f32.mrf.mxu1 }
  0xdf   : > { %1194 = vmatprep.subr.bf16.mxu0 %v1278_v6  ;;  %v523_v45 = vadd.f32 %v522_v41, %v407_v43 }
  0xe0   : > { %v1138_v44 = vpop.f32.mrf.mxu1 }
  0xe1   : > { %v530_v48 = vmax.f32 %v523_v45, 0.0 }
  0xe2   : > { %1195 = vmatpush3.bf16.msra.mxu0 %v1247_v35  ;;  %v525_v46 = vpop.f32.mrf.mxu1 }
  0xe3   : > { %1196 = vmatprep.subr.bf16.mxu0 %v1278_v6  ;;  %v533_v50 = vpack.c.bf16 %v530_v48, %v530_v48 }
  0xe4   : > { %v1139_v49 = vpop.f32.mrf.mxu1 }
  0xe6   : > { %1197 = vmatpush3.bf16.msra.mxu0 %v1249_v36 }
  0xe7   : > { %1198 = vmatprep.subr.bf16.mxu0 %v1278_v6 }
  0xea   : > { %1199 = vmatpush3.bf16.msra.mxu0 %v1251_v37 }
  0xeb   : > { %1200 = vmatprep.subr.bf16.mxu0 %v1278_v6 }
  0xee   : > { %1201 = vmatpush3.bf16.msra.mxu0 %v1253_v38 }
  0xef   : > { %1202 = vmatprep.subr.bf16.mxu0 %v1278_v6 }
  0xf2   : > { %1203 = vmatpush3.bf16.msra.mxu0 %v1255_v39 }
  0xf3   : > { %1204 = vmatprep.subr.bf16.mxu0 %v1278_v6 }
  0xf6   : > { %1205 = vmatpush3.bf16.msra.mxu0 %v1257_v42 }
  0xf7   : > { %1206 = vmatprep.subr.bf16.mxu0 %v1278_v6 }
  0xfa   : > { %1207 = vmatpush3.bf16.msra.mxu0 %v1259_v47 }
  0xfd   : > { %1209 = vmatmul.mubr.bf16.vlgmr.msra.gmra.mxu0 %v533_v50 }
 0x19d   : > { %v639_v52 = vpop.f32.mrf.mxu0 }
 0x19e   : > { %v640_v53 = vadd.f32 %v1062_v51, %v639_v52 }
 0x19f   : > { %v1158_v54 = vpop.f32.mrf.mxu0 }
 0x1a0   : > { %v645_v55 = vmax.f32 %v640_v53, 0.0 }
 0x1a1   : > { %v642_v56 = vpop.f32.mrf.mxu0 }
 0x1a2   : > { %v646_v58 = vpack.c.bf16 %v645_v55, %v645_v55 }
 0x1a3   : > { %v1159_v59 = vpop.f32.mrf.mxu0 }
 0x1a4   : > { %1169 = vmatmul.mubr.msk.bf16.vlgmr.msra.gmra.mxu1 %vm686_vm2, %v646_v58 }
 0x1a5   : > { %1173 = vmatpush3.bf16.msra.mxu1 %v1246_v57  ;;  %1188 = vmatprep.mubr.msk.bf16.mxu1 %vm1279_vm1, %v1278_v6 }
 0x1a6   : > { %1174 = vmatprep.subr.bf16.mxu1 %v1278_v6 }
 0x1a9   : > { %1175 = vmatpush3.bf16.msra.mxu1 %v1248_v60 }
 0x1aa   : > { %1176 = vmatprep.subr.bf16.mxu1 %v1278_v6 }
 0x1ad   : > { %1177 = vmatpush3.bf16.msra.mxu1 %v1250_v61 }
 0x1ae   : > { %1178 = vmatprep.subr.bf16.mxu1 %v1278_v6 }
 0x1b1   : > { %1179 = vmatpush3.bf16.msra.mxu1 %v1252_v62 }
 0x1b2   : > { %1180 = vmatprep.subr.bf16.mxu1 %v1278_v6 }
 0x1b5   : > { %1181 = vmatpush3.bf16.msra.mxu1 %v1254_v63 }
 0x1b6   : > { %1182 = vmatprep.subr.bf16.mxu1 %v1278_v6 }
 0x1b9   : > { %1183 = vmatpush3.bf16.msra.mxu1 %v1256_v1 }
 0x1ba   : > { %1184 = vmatprep.subr.bf16.mxu1 %v1278_v6 }
 0x1bd   : > { %1185 = vmatpush3.bf16.msra.mxu1 %v1258_v3  ;;  %v960_v9 = vpop.f32.mrf.mxu0 }
 0x1be   : > { %1186 = vmatprep.subr.bf16.mxu1 %v1278_v6  ;;  %v961_v24 = vadd.f32 %v1086_v21, %v960_v9 }
 0x1bf   : > { %v1210_v10 = vpop.f32.mrf.mxu0 }
 0x1c0   : > { %v967_v29 = vsel %vm966_vm5, %v961_v24, -inf }
 0x1c1   : > { %1187 = vmatpush3.bf16.msra.mxu1 %v1260_v5  ;;  %v963_v11 = vpop.f32.mrf.mxu0 }
 0x1c3   : > { %v1211_v12 = vpop.f32.mrf.mxu0 }
 0x1c4   : > { %1189 = vmatmul.mubr.bf16.vlgmr.msra.gmra.mxu1 %v532_v8 }
 0x264   : > { %v724_v14 = vpop.f32.mrf.mxu1 }
 0x265   : > { %v725_v15 = vadd.f32 %v1071_v13, %v724_v14 }
 0x266   : > { %v1170_v16 = vpop.f32.mrf.mxu1 }
 0x267   : > { %v730_v17 = vmax.f32 %v725_v15, 0.0 }
 0x268   : > { %v727_v18 = vpop.f32.mrf.mxu1 }
 0x269   : > { %v731_v19 = vmin.f32 %v730_v17, 9.0 }
 0x26a   : > { %v1171_v20 = vpop.f32.mrf.mxu1 }
 0x26b   : > { %979 = vst.msk [vmem:[%s1526_s27] sm:$0xff] %vm978_vm3, %v731_v19 }
 0x284   : > { %v837_v23 = vpop.f32.mrf.mxu1 }
 0x285   : > { %v838_v25 = vadd.f32 %v1077_v22, %v837_v23 }
 0x286   : > { %v1190_v26 = vpop.f32.mrf.mxu1 }
 0x287   : > { %v844_v27 = vsel %vm843_vm4, %v838_v25, -inf }
 0x288   : > { %845 = vmax.xlane.f32.xlu0 %v844_v27  ;;  %v840_v28 = vpop.f32.mrf.mxu1 }
 0x28a   : > { %v1191_v30 = vpop.f32.mrf.mxu1 }
 0x28c   : > { %968 = vmax.xlane.f32.xlu0 %v967_v29 }
 0x311   : > { %v846_v31 = vpop.xlane.xlu0 %845 }
 0x312   : > { %v847_v32 = vsub.f32 %v838_v25, %v846_v31 }
 0x314   : > { %v848_v33 = vmul.f32 1.442695, %v847_v32 }
 0x315   : > { %v969_v34 = vpop.xlane.xlu0 %968 }
 0x316   : > { %1261 = vpow2.f32 %v848_v33  ;;  %v970_v35 = vsub.f32 %v961_v24, %v969_v34 }
 0x318   : > { %v971_v36 = vmul.f32 1.442695, %v970_v35 }
 0x31a   : > { %1263 = vpow2.f32 %v971_v36 }
 0x323   : > { %v1262_v37 = vpop.eup %1261 }
 0x324   : > { %v850_v38 = vsel %vm843_vm4, %v1262_v37, 0.0 }
 0x325   : > { %851 = vadd.xlane.f32.xlu1 %v850_v38 }
 0x327   : > { %v1264_v39 = vpop.eup %1263 }
 0x328   : > { %v973_v40 = vsel %vm966_vm5, %v1264_v39, 0.0 }
 0x329   : > { %974 = vadd.xlane.f32.xlu1 %v973_v40 }
 0x3ae   : > { %v852_v41 = vpop.xlane.xlu1 %851 }
 0x3af   : > { %1265 = vrcp.f32 %v852_v41 }
 0x3b2   : > { %v975_v42 = vpop.xlane.xlu1 %974 }
 0x3b3   : > { %1267 = vrcp.f32 %v975_v42 }
 0x3bc   : > { %v1266_v43 = vpop.eup %1265 }
 0x3bd   : > { %v854_v44 = vmul.f32 %v1266_v43, %v1262_v37 }
 0x3bf   : > { %981 = vrot.lane.b32.xlu0 %v854_v44, %s1280_s12 }
 0x3c0   : > { %v1268_v45 = vpop.eup %1267 }
 0x3c1   : > { %v977_v46 = vmul.f32 %v1268_v45, %v1264_v39 }
 0x3c3   : > { %987 = vrot.lane.b32.xlu1 %v977_v46, %s1281_s13 }
 0x431   : > { %v982_v47 = vpop.permute.xlu0 %981 }
 0x432   : > { %985 = vst.msk [vmem:[%s1526_s27] sm:$0xff] %vm984_vm6, %v982_v47 }
 0x435   : > { %v988_v48 = vpop.permute.xlu1 %987 }
 0x436   : > { %991 = vst.msk [vmem:[%s1526_s27] sm:$0xff] %vm990_vm7, %v988_v48 }
 0x437   : > { %993 = vst.msk [vmem:[%s1526_s27] sm:$0xff] %vm992_vm8, %v1278_v6 }
 0x438 PF: > { %s23_s19 = sadd.s32 1, %s1275_s19  }
 0x439   : > { %p20_p4 = scmp.ge.s32.totalorder %s23_s19, 4  }
 0x43b   :  { %22 = sbr.rel (!%p20_p4) target bundleno = 3 (0x3), region = 94 }

</bundles_post_ra>
